<compile_context>
chip_gen: v7x
topology: tpu7x:2x2x1
jax: 0.10.0
libtpu: 0.0.40
codegen_flags: <defaults>
</compile_context>

<pallas_src>
import jax
import jax.numpy as jnp
from jax.experimental import pallas as pl
from jax.experimental.pallas import tpu as pltpu


_VMEM_LIMIT_BYTES = 32 * 1024 * 1024   # safe on v5e/v6e (128 MiB) and v7x (64 MiB)
_TILE_VMEM_BUDGET = 12 * 1024 * 1024   # target double-buffered tile footprint


def _compiler_params(*semantics):
    return pltpu.CompilerParams(dimension_semantics=tuple(semantics),
                                vmem_limit_bytes=_VMEM_LIMIT_BYTES)


def _pick_row_tile(n_rows, n_cols, itemsize, *, n_tiled_operands=2, min_grid=4):
    """Largest row tile (multiple of 8) that divides n_rows, fits the VMEM
    budget when double-buffered, and (if possible) leaves >= min_grid grid
    steps so both v7x TensorCores get work."""
    fallback = None
    for t in (4096, 2048, 1024, 512, 256, 128, 64, 32, 16, 8):
        if t > n_rows or n_rows % t:
            continue
        if 2 * n_tiled_operands * t * n_cols * itemsize > _TILE_VMEM_BUDGET:
            continue
        if n_rows // t >= min_grid:
            return t
        if fallback is None:
            fallback = t
    if fallback is not None:
        return fallback
    # TODO(synk): row counts not a multiple of 8 fall back to one full block;
    # fine for small banks, may exceed scoped VMEM for very large ones.
    return n_rows


def _pick_update_row_tile(n_rows):
    """Small row tile for the enqueue so the read-modify-write only touches
    O(batch + tile) rows."""
    for t in (128, 64, 32, 16, 8):
        if t <= n_rows and n_rows % t == 0:
            return t
    return n_rows


# --------------------------------------------------------------------------
# Kernel 1: ring-buffer enqueue over touched tiles only (in-place via alias).
#   scalar prefetch: ptr (write offset), nw (rows to write, = min(B, N-ptr))
# --------------------------------------------------------------------------
def _make_enqueue_call(n, d, nb, dtype, tn):
    n_tiles = n // tn
    grid = (min(pl.cdiv(nb, tn) + 1, n_tiles),)   # at most ceil(B/tn)+1 tiles touched

    def bank_index_map(i, ptr_ref, nw_ref):
        first = ptr_ref[0] // tn
        return (jnp.minimum(first + i, n_tiles - 1), 0)

    def kernel(ptr_ref, nw_ref, batch_ref, bank_ref, out_ref):
        ptr = ptr_ref[0]
        nw = nw_ref[0]
        tile_idx = jnp.minimum(ptr // tn + pl.program_id(0), n_tiles - 1)
        tile_start = tile_idx * tn

        tile = bank_ref[...]                                    # [tn, d]
        batch = batch_ref[...]                                  # [nb, d] resident

        # Which batch row lands on each tile row (may be out of range).
        rel = tile_start - ptr + jax.lax.broadcasted_iota(jnp.int32, (tn, 1), 0)
        write_mask = (rel >= 0) & (rel < nw)                    # [tn, 1]

        # Vectorized "gather" of batch rows via one-hot matmul on the MXU.
        col = jax.lax.broadcasted_iota(jnp.int32, (tn, nb), 1)
        onehot = (rel == col).astype(batch.dtype)               # [tn, nb]
        gathered = jnp.dot(onehot, batch,
                           preferred_element_type=jnp.float32).astype(tile.dtype)

        out_ref[...] = jnp.where(write_mask, gathered, tile)

    return pl.pallas_call(
        kernel,
        out_shape=jax.ShapeDtypeStruct((n, d), dtype),
        grid_spec=pltpu.PrefetchScalarGridSpec(
            num_scalar_prefetch=2,
            grid=grid,
            in_specs=[
                pl.BlockSpec((nb, d), lambda i, *_: (0, 0)),    # batch (resident)
                pl.BlockSpec((tn, d), bank_index_map),          # touched bank tile
            ],
            out_specs=pl.BlockSpec((tn, d), bank_index_map),    # same tile, aliased
        ),
        # bank is operand 3 (after the 2 scalar-prefetch operands and the batch):
        # alias it to the output so untouched tiles are never copied.
        input_output_aliases={3: 0},
        compiler_params=_compiler_params("arbitrary"),
    )


def _bank_enqueue(bank, batch, ptr, n_write):
    n, d = bank.shape
    nb = batch.shape[0]
    tn = _pick_update_row_tile(n)
    call = _make_enqueue_call(n, d, nb, bank.dtype, tn)
    return call(ptr.reshape(1).astype(jnp.int32),
                n_write.reshape(1).astype(jnp.int32),
                batch.astype(bank.dtype), bank)


# --------------------------------------------------------------------------
# Kernel 2: snapshot transpose (only when feature_dim_first=True).
# --------------------------------------------------------------------------
def _transpose_kernel(bank_ref, out_ref):
    out_ref[...] = bank_ref[...].T


def _bank_transpose(bank):
    n, d = bank.shape
    tn = _pick_row_tile(n, d, bank.dtype.itemsize, n_tiled_operands=2)
    return pl.pallas_call(
        _transpose_kernel,
        out_shape=jax.ShapeDtypeStruct((d, n), bank.dtype),
        grid=(n // tn,),
        in_specs=[pl.BlockSpec((tn, d), lambda i: (i, 0))],
        out_specs=pl.BlockSpec((d, tn), lambda i: (0, i)),      # lane-dense output
        compiler_params=_compiler_params("parallel"),
    )(bank)


# --------------------------------------------------------------------------
# Kernel 3: row-wise L2 normalize (bank init, F.normalize dim=-1, eps=1e-12).
# --------------------------------------------------------------------------
def _l2_normalize_kernel(x_ref, o_ref):
    x = x_ref[...]
    nsq = jnp.sum(x * x, axis=-1, keepdims=True)
    o_ref[...] = x * jax.lax.rsqrt(jnp.maximum(nsq, 1e-24))     # = x / max(|x|, 1e-12)


def _l2_normalize_rows(x):
    n, d = x.shape
    tn = _pick_row_tile(n, d, x.dtype.itemsize, n_tiled_operands=2)
    return pl.pallas_call(
        _l2_normalize_kernel,
        out_shape=jax.ShapeDtypeStruct((n, d), x.dtype),
        grid=(n // tn,),
        in_specs=[pl.BlockSpec((tn, d), lambda i: (i, 0))],
        out_specs=pl.BlockSpec((tn, d), lambda i: (i, 0)),
        compiler_params=_compiler_params("parallel"),
    )(x)


# --------------------------------------------------------------------------
# Functional module API.
# --------------------------------------------------------------------------
def init_memory_bank(key, size, dtype=jnp.float32):
    """MemoryBankModule._init_memory_bank: randn + L2-normalize, ptr = 0."""
    n, d = size
    bank = jax.random.normal(key, (n, d), dtype)
    bank = _l2_normalize_rows(bank)
    return bank, jnp.zeros((1,), jnp.int32)


def memory_bank_forward(output, bank, bank_ptr, *, update=False,
                        feature_dim_first=True):
    """Functional port of MemoryBankModule.forward.

    Returns ((output, negatives), new_bank, new_bank_ptr). `negatives` has
    shape (dim, num_features) if feature_dim_first else (num_features, dim);
    it is a snapshot of the bank taken BEFORE the update.
    """
    if bank.shape[0] == 0:                  # size[0] == 0 -> memory bank disabled
        return (output, None), bank, bank_ptr

    n, _ = bank.shape
    b = output.shape[0]
    ptr = bank_ptr[0].astype(jnp.int32)

    # The pre-update snapshot is `bank` itself (immutable). The (dim, N) layout
    # is only materialized when requested; consumers doing a matmul could fold
    # the transpose into their dot_general instead.
    negatives = _bank_transpose(bank) if feature_dim_first else bank

    if update:
        n_write = jnp.minimum(jnp.int32(b), jnp.int32(n) - ptr)
        new_bank = _bank_enqueue(bank, output, ptr, n_write)
        new_ptr = jnp.where(ptr + b >= n, jnp.int32(0),
                            ptr + jnp.int32(b)).reshape(1)
    else:
        new_bank, new_ptr = bank, bank_ptr

    return (output, negatives), new_bank, new_ptr


if __name__ == "__main__":
    key = jax.random.PRNGKey(0)
    k_bank, k_out = jax.random.split(key)

    N, D, B = 1024, 128, 8
    bank, bank_ptr = init_memory_bank(k_bank, (N, D))
    output = jax.random.normal(k_out, (B, D), jnp.float32)
    jax.block_until_ready((bank, bank_ptr, output))

    # Bank rows are unit-normalized.
    norms = jnp.sqrt(jnp.sum(bank * bank, axis=-1))
    assert jnp.allclose(norms, 1.0, atol=1e-3)

    # 1) update=True, feature_dim_first=True, ptr=0.
    (out, negatives), bank1, ptr1 = memory_bank_forward(
        output, bank, bank_ptr, update=True, feature_dim_first=True)
    jax.block_until_ready((out, negatives, bank1, ptr1))
    assert out.shape == (B, D) and negatives.shape == (D, N)
    assert int(ptr1[0]) == B
    assert jnp.allclose(negatives, bank.T)          # snapshot taken before update
    assert jnp.allclose(bank1[:B], output)          # rows enqueued at ptr=0
    assert jnp.allclose(bank1[B:], bank[B:])        # rest untouched

    # 2) query-only path (update=False).
    (_, neg2), bank2, ptr2 = memory_bank_forward(
        output, bank1, ptr1, update=False, feature_dim_first=True)
    jax.block_until_ready(neg2)
    assert jnp.allclose(neg2, bank1.T)
    assert jnp.allclose(bank2, bank1) and int(ptr2[0]) == B

    # 3) feature_dim_first=False: row-major snapshot, no transpose kernel.
    (_, neg3), _, _ = memory_bank_forward(
        output, bank1, ptr1, update=False, feature_dim_first=False)
    assert neg3.shape == (N, D) and jnp.allclose(neg3, bank1)

    # 4) unaligned ptr spanning two row tiles.
    ptr_mid = jnp.array([250], jnp.int32)
    (_, _), bank4, ptr4 = memory_bank_forward(
        output, bank1, ptr_mid, update=True, feature_dim_first=False)
    jax.block_until_ready((bank4, ptr4))
    assert int(ptr4[0]) == 250 + B
    assert jnp.allclose(bank4[250:250 + B], output)
    assert jnp.allclose(bank4[:250], bank1[:250])
    assert jnp.allclose(bank4[250 + B:], bank1[250 + B:])

    # 5) wraparound: only the first N - ptr rows are written, ptr resets to 0.
    ptr_wrap = jnp.array([N - 3], jnp.int32)
    (_, _), bank5, ptr5 = memory_bank_forward(
        output, bank1, ptr_wrap, update=True, feature_dim_first=False)
    jax.block_until_ready((bank5, ptr5))
    assert int(ptr5[0]) == 0
    assert jnp.allclose(bank5[N - 3:], output[:3])
    assert jnp.allclose(bank5[:N - 3], bank1[:N - 3])

    # 6) disabled memory bank (size[0] == 0) returns (output, None).
    empty_bank = jnp.zeros((0, D), jnp.float32)
    (out6, neg6), _, _ = memory_bank_forward(
        output, empty_bank, jnp.zeros((1,), jnp.int32), update=True)
    assert neg6 is None and out6.shape == (B, D)

    print("KERNEL_OK")
</pallas_src>

<mosaic_0001>
module attributes {stable_mosaic.version = 11 : i64} {
  func.func @_l2_normalize_kernel(%arg0: i32, %arg1: memref<256x128xf32, #tpu.memory_space<vmem>>, %arg2: memref<256x128xf32, #tpu.memory_space<vmem>>) attributes {dimension_semantics = [#tpu.dimension_semantics<parallel>], iteration_bounds = array<i64: 4>, scalar_prefetch = 0 : i64, scratch_operands = 0 : i64, tpu.core_type = #tpu.core_type<tc>, window_params = [{transform_indices = @transform_0, window_bounds = array<i64: 256, 128>}, {transform_indices = @transform_1, window_bounds = array<i64: 256, 128>}]} {
    %c0 = arith.constant 0 : index
    %c0_0 = arith.constant 0 : index
    %0 = vector.load %arg1[%c0, %c0_0] : memref<256x128xf32, #tpu.memory_space<vmem>>, vector<256x128xf32>
    %1 = arith.mulf %0, %0 : vector<256x128xf32>
    %cst = arith.constant dense<0.000000e+00> : vector<256xf32>
    %2 = vector.multi_reduction <add>, %1, %cst [1] : vector<256x128xf32> to vector<256xf32>
    %3 = vector.shape_cast %2 : vector<256xf32> to vector<256x1xf32>
    %cst_1 = arith.constant 1.000000e-24 : f32
    %4 = vector.broadcast %cst_1 : f32 to vector<256x1xf32>
    %5 = arith.maximumf %3, %4 : vector<256x1xf32>
    %6 = math.rsqrt %5 : vector<256x1xf32>
    %7 = vector.broadcast %6 : vector<256x1xf32> to vector<256x128xf32>
    %8 = arith.mulf %0, %7 : vector<256x128xf32>
    %c0_2 = arith.constant 0 : index
    %c0_3 = arith.constant 0 : index
    %9 = vector.load %arg2[%c0_2, %c0_3] : memref<256x128xf32, #tpu.memory_space<vmem>>, vector<256x128xf32>
    tpu.vector_store %arg2[%c0_2, %c0_3], %8 {strides = array<i32>} : memref<256x128xf32, #tpu.memory_space<vmem>>, vector<256x128xf32>,
    return
  }
  func.func @transform_0(%arg0: i32) -> (i32, i32) {
    %c0_i32 = arith.constant 0 : i32
    %c0_i32_0 = arith.constant 0 : i32
    return %arg0, %c0_i32 : i32, i32
  }
  func.func @transform_1(%arg0: i32) -> (i32, i32) {
    %c0_i32 = arith.constant 0 : i32
    %c0_i32_0 = arith.constant 0 : i32
    return %arg0, %c0_i32 : i32, i32
  }
}

</mosaic_0001>

<bundles_post_ra>
// kernel: tpu_custom_call.1
= control target key start
LH: loop header
LB: loop body
LE: loop exit
PB: predicated region body
PF: predicated region fallthrough
CT: control target
= control target key end

     0   :  { %6 = vsyncpa [#allocation3], 0  ;;  %s1117_s0 = inlined_call_operand.hbm [shape: f32[1024,128], index: 0, kind: input, shape index: {}]   ;;  %s1118_s1 = inlined_call_operand.hbm [shape: f32[1024,128], index: 1, kind: output, shape index: {}]  }
   0x1   :  { %8 = vsyncpa [#allocation3 + $0x1], 0 }
   0x2   :  { %9 = vsyncpa [#allocation4], 0 }
   0x3   :  { %11 = vsyncpa [#allocation4 + $0x1], 0  ;;  %s724_s6 = smov 0   ;;  %s726_s7 = smov 0  }
   0x4   :  { %s728_s8 = smov 0   ;;  %s730_s9 = smov 0  }
   0x5 LB: > { %s745_s10 = sadd.s32 4294967295, %s706_s9   ;;  %s480_s11 = sadd.s32 4294967294, %s706_s9   ;;  %s706_s9 = sphi %s730_s9, %s1130_s9   ;;  %s702_s8 = sphi %s728_s8, %s1129_s8   ;;  %s698_s7 = sphi %s726_s7, %s1128_s7   ;;  %s694_s6 = sphi %s724_s6, %s1127_s6  }
   0x6   : > { %s749_s12 = sadd.s32 1, %s706_s9   ;;  %s24_s13 = sadd.s32 1, %s702_s8 }
   0x7   : > { %s21_s14 = ssub.s32 %s706_s9, %s749_s12  ;;  %p31_p0 = scmp.ne.s32.totalorder %s702_s8, %s698_s7 }
   0x8   : > { %p22_p1 = scmp.eq.s32.totalorder %s21_s14, 0  ;;  %p32_p2 = scmp.eq.s32.totalorder %s706_s9, 0 }
   0x9   : > { %p37_p3 = scmp.ne.s32.totalorder %s698_s7, %s694_s6  ;;  %p38_p4 = scmp.eq.s32.totalorder %s745_s10, 0 }
   0xa   : > { %s761_s15 = scalar_select %p22_p1, %s702_s8, %s24_s13  }
   0xb   : > { %p763_p5 = por %p32_p2, %p31_p0  ;;  %p767_p6 = por %p38_p4, %p37_p3 }
   0xc   : > { %p61_p7 = scmp.eq.s32.totalorder %s745_s10, 3  ;;  %p67_p8 = scmp.eq.s32.totalorder %s480_s11, 3 }
   0xd   : > { %p508_p9 = scmp.lt.s32.totalorder %s706_s9, 4  ;;  %s87_s20 = sand.u32 1, %s702_s8  }
   0xe   : > { %p773_p10 = por %p61_p7, %p31_p0  ;;  %p777_p11 = por %p67_p8, %p37_p3 }
   0xf   : > { %s494_s21 = sshll.u32 %s706_s9, 12  ;;  %s483_s22 = sshll.u32 %s87_s20, 8 }
  0x10   : > { %s1122_s18 = scalar_select %p773_p10, 1, 0 }
  0x11   : > { %s1123_s19 = scalar_select %p777_p11, 1, 0 }
  0x12   : > { %s786_s25 = scalar_lea.hbm %s1117_s0, %s494_s21  ;;  %s91_s26 = scalar_lea.vmem [#allocation2], %s483_s22 }
  0x13   : > { %s98_s27 = sshll.u32 %s91_s26, 4  ;;  %p790_p12 = pnand %p508_p9, %p763_p5  ;;  %s794_s27 = int_to_ptr.vmem [resolvable:$true] %s98_s27 }
  0x14   : > { %s796_s29 = scalar_lea.sflag [#allocation3], %s87_s20  ;;  %s610_s30 = scalar_lea.hbm %s786_s25, 4096 }
  0x15   : > { %p611_p13 = scmp.ne.s32.totalorder %s786_s25, %s610_s30  ;;  %p612_p0 = pneg %p790_p12 }
  0x16   : > { %s615_s4 = scalar_lea.hbm %s1117_s0, 16384  ;;  %p616_p3 = scmp.lt.u32.totalorder %s786_s25, %s1117_s0 }
  0x17   : > { %p613_p1 = pnand %p612_p0, %p611_p13  ;;  %p617_p4 = scmp.lt.u32.totalorder %s615_s4, %s610_s30 }
  0x18   : > { %p619_p7 = scmp.lt.u32.totalorder %s610_s30, %s786_s25 }
  0x19   : > { %p614_p2 = pneg %p613_p1  ;;  %p618_p5 = por %p617_p4, %p616_p3 }
  0x1b   : > { %p620_p8 = por %p619_p7, %p618_p5 }
  0x1d   : > { %p621_p9 = pnand %p620_p8, %p614_p2 }
  0x1f   : > { %624 = shalt.err (!%p621_p9)
}
  0x20   : > { %s625_s13 = scalar_lea.vmem %s794_s27, 4096  ;;  %s708_s14 = smov [#allocation2]  }
  0x21   : > { %p626_p13 = scmp.ne.s32.totalorder %s794_s27, %s625_s13  ;;  %s630_s16 = sshll.u32 %s708_s14, 4  ;;  %s631_s16 = int_to_ptr.vmem [resolvable:$false] %s630_s16 }
  0x22   : > { %s632_s20 = scalar_lea.vmem %s631_s16, 8192  ;;  %p633_p10 = scmp.lt.s32.totalorder %s794_s27, %s631_s16 }
  0x23   : > { %p628_p1 = pnand %p626_p13, %p612_p0  ;;  %p634_p3 = scmp.lt.s32.totalorder %s632_s20, %s625_s13 }
  0x25   : > { %p629_p11 = pneg %p628_p1  ;;  %p635_p4 = por %p634_p3, %p633_p10 }
  0x27   : > { %p636_p5 = pnand %p635_p4, %p629_p11 }
  0x29   : > { %639 = shalt.err (!%p636_p5)
}
  0x2a   : > { %s709_s21 = smov 128   ;;  %s710_s22 = smov 8  }
  0x2b   : > { %503 = dma.hbm_to_vmem [thread:$0]  (!%p790_p12), %s786_s25, 4096, %s794_s27, %s796_s29, %s709_s21, %s709_s21, %s710_s22  }
  0x2c   : > { %p486_p0 = scmp.ge.s32.totalorder %s706_s9, 1  ;;  %p106_p2 = scmp.lt.s32.totalorder %s706_s9, 5 }
  0x2e   : > { %p107_p7 = pnand %p486_p0, %p106_p2 }
  0x2f   : > { %s827_s23 = sand.u32 (!%p107_p7), 1, %s698_s7  }
  0x30   : > { %110 = sbr.rel (%p107_p7) target bundleno = 292 (0x124), region = 24  ;;  %s487_s24 = sshll.u32 (!%p107_p7), %s827_s23, 8 }
  0x31   : > { %s113_s26 = scalar_lea.sflag (!%p107_p7), [#allocation3], %s827_s23  ;;  %s833_s30 = scalar_lea.vmem (!%p107_p7), [#allocation2], %s487_s24 }
  0x37   : > { %685 = dma.done.wait (%p767_p6), %s113_s26, 4096  }
  0x38   : > { %687 = vsyncadd (%p767_p6), %s113_s26, 4294963200  ;;  %v840_v0 = vld [vmem:[%s833_s30 + $0x10] sm:$0xff]  ;;  %v843_v1 = vld [vmem:[%s833_s30] sm:$0xff]  ;;  %s1003_s17 = scalar_lea.vmem [#allocation5], %s487_s24  ;;  %s495_s25 = sshll.u32 %s745_s10, 12 }
  0x39   : > { %v846_v2 = vld [vmem:[%s833_s30 + $0x18] sm:$0xff]  ;;  %v171_v3 = vmul.f32 %v840_v0, %v840_v0  ;;  %v169_v4 = vmul.f32 %v843_v1, %v843_v1  ;;  %v853_v5 = vld [vmem:[%s833_s30 + $0x8] sm:$0xff]  ;;  %v863_v9 = vld [vmem:[%s833_s30 + $0x20] sm:$0xff]  ;;  %s407_s27 = sshll.u32 %s1003_s17, 4  ;;  %s1069_s2 = scalar_lea.hbm %s1118_s1, %s495_s25  ;;  %s1071_s27 = int_to_ptr.vmem [resolvable:$true] %s407_s27 }
  0x3a   : > { %v172_v6 = vmul.f32 %v846_v2, %v846_v2  ;;  %v170_v7 = vmul.f32 %v853_v5, %v853_v5  ;;  %v860_v8 = vld [vmem:[%s833_s30 + $0x28] sm:$0xff]  ;;  %v173_v11 = vmul.f32 %v863_v9, %v863_v9  ;;  %v870_v12 = vld [vmem:[%s833_s30 + $0x38] sm:$0xff]  ;;  %v873_v13 = vld [vmem:[%s833_s30 + $0x30] sm:$0xff]  ;;  %s394_s10 = scalar_lea.sflag [#allocation4], %s827_s23  ;;  %s640_s3 = scalar_lea.vmem %s1071_s27, 4096 }
  0x3b   : > { %205 = vadd.xlane.f32.xlu1 %v171_v3  ;;  %201 = vadd.xlane.f32.xlu0 %v169_v4  ;;  %v174_v10 = vmul.f32 %v860_v8, %v860_v8  ;;  %v176_v14 = vmul.f32 %v870_v12, %v870_v12  ;;  %v175_v15 = vmul.f32 %v873_v13, %v873_v13  ;;  %v880_v16 = vld [vmem:[%s833_s30 + $0x48] sm:$0xff]  ;;  %v883_v17 = vld [vmem:[%s833_s30 + $0x40] sm:$0xff]  ;;  %v890_v20 = vld [vmem:[%s833_s30 + $0x58] sm:$0xff]  ;;  %p641_p6 = scmp.ne.s32.totalorder %s1071_s27, %s640_s3  ;;  %p1125_p10 = scmp.ne.s32.totalorder %s1122_s18, 0 }
  0x3c   : > { %v178_v18 = vmul.f32 %v880_v16, %v880_v16  ;;  %v177_v19 = vmul.f32 %v883_v17, %v883_v17  ;;  %v893_v21 = vld [vmem:[%s833_s30 + $0x50] sm:$0xff]  ;;  %v180_v22 = vmul.f32 %v890_v20, %v890_v20  ;;  %v900_v24 = vld [vmem:[%s833_s30 + $0x68] sm:$0xff]  ;;  %v903_v25 = vld [vmem:[%s833_s30 + $0x60] sm:$0xff]  ;;  %s711_s4 = smov [#allocation5]  }
  0x3d   : > { %v179_v23 = vmul.f32 %v893_v21, %v893_v21  ;;  %v182_v26 = vmul.f32 %v900_v24, %v900_v24  ;;  %v181_v27 = vmul.f32 %v903_v25, %v903_v25  ;;  %v910_v28 = vld [vmem:[%s833_s30 + $0x78] sm:$0xff]  ;;  %v913_v29 = vld [vmem:[%s833_s30 + $0x70] sm:$0xff]  ;;  %v920_v32 = vld [vmem:[%s833_s30 + $0x88] sm:$0xff]  ;;  %p642_p11 = pnand %p641_p6, %p1125_p10  ;;  %s644_s5 = sshll.u32 %s711_s4, 4  ;;  %s645_s5 = int_to_ptr.vmem [resolvable:$false] %s644_s5 }
  0x3e   : > { %v184_v30 = vmul.f32 %v910_v28, %v910_v28  ;;  %v183_v31 = vmul.f32 %v913_v29, %v913_v29  ;;  %v923_v33 = vld [vmem:[%s833_s30 + $0x80] sm:$0xff]  ;;  %v186_v34 = vmul.f32 %v920_v32, %v920_v32  ;;  %v930_v36 = vld [vmem:[%s833_s30 + $0x98] sm:$0xff]  ;;  %v933_v37 = vld [vmem:[%s833_s30 + $0x90] sm:$0xff]  ;;  %s646_s11 = scalar_lea.vmem %s645_s5, 8192  ;;  %p647_p8 = scmp.lt.s32.totalorder %s1071_s27, %s645_s5 }
  0x3f   : > { %207 = vadd.xlane.f32.xlu1 %v172_v6  ;;  %203 = vadd.xlane.f32.xlu0 %v170_v7  ;;  %v185_v35 = vmul.f32 %v923_v33, %v923_v33  ;;  %v188_v38 = vmul.f32 %v930_v36, %v930_v36  ;;  %v187_v39 = vmul.f32 %v933_v37, %v933_v37  ;;  %v940_v40 = vld [vmem:[%s833_s30 + $0xa8] sm:$0xff]  ;;  %v943_v41 = vld [vmem:[%s833_s30 + $0xa0] sm:$0xff]  ;;  %v950_v44 = vld [vmem:[%s833_s30 + $0xb8] sm:$0xff]  ;;  %p643_p12 = pneg %p642_p11  ;;  %p648_p9 = scmp.lt.s32.totalorder %s646_s11, %s640_s3 }
  0x40   : > { %v190_v42 = vmul.f32 %v940_v40, %v940_v40  ;;  %v189_v43 = vmul.f32 %v943_v41, %v943_v41  ;;  %v953_v45 = vld [vmem:[%s833_s30 + $0xb0] sm:$0xff]  ;;  %v192_v46 = vmul.f32 %v950_v44, %v950_v44  ;;  %v960_v48 = vld [vmem:[%s833_s30 + $0xc8] sm:$0xff]  ;;  %v963_v49 = vld [vmem:[%s833_s30 + $0xc0] sm:$0xff] }
  0x41   : > { %v191_v47 = vmul.f32 %v953_v45, %v953_v45  ;;  %v194_v50 = vmul.f32 %v960_v48, %v960_v48  ;;  %v193_v51 = vmul.f32 %v963_v49, %v963_v49  ;;  %v970_v52 = vld [vmem:[%s833_s30 + $0xd8] sm:$0xff]  ;;  %v973_v53 = vld [vmem:[%s833_s30 + $0xd0] sm:$0xff]  ;;  %v980_v56 = vld [vmem:[%s833_s30 + $0xe8] sm:$0xff]  ;;  %p649_p13 = por %p648_p9, %p647_p8 }
  0x42   : > { %v196_v54 = vmul.f32 %v970_v52, %v970_v52  ;;  %v195_v55 = vmul.f32 %v973_v53, %v973_v53  ;;  %v983_v57 = vld [vmem:[%s833_s30 + $0xe0] sm:$0xff]  ;;  %v198_v58 = vmul.f32 %v980_v56, %v980_v56  ;;  %v990_v60 = vld [vmem:[%s833_s30 + $0xf8] sm:$0xff]  ;;  %v993_v61 = vld [vmem:[%s833_s30 + $0xf0] sm:$0xff] }
  0x43   : > { %211 = vadd.xlane.f32.xlu1 %v174_v10  ;;  %209 = vadd.xlane.f32.xlu0 %v173_v11  ;;  %v197_v59 = vmul.f32 %v983_v57, %v983_v57  ;;  %v200_v62 = vmul.f32 %v990_v60, %v990_v60  ;;  %v199_v63 = vmul.f32 %v993_v61, %v993_v61  ;;  %p650_p1 = pnand %p649_p13, %p643_p12 }
  0x47   : > { %215 = vadd.xlane.f32.xlu1 %v176_v14  ;;  %213 = vadd.xlane.f32.xlu0 %v175_v15 }
  0x4b   : > { %219 = vadd.xlane.f32.xlu1 %v178_v18  ;;  %217 = vadd.xlane.f32.xlu0 %v177_v19 }
  0x4f   : > { %223 = vadd.xlane.f32.xlu1 %v180_v22  ;;  %221 = vadd.xlane.f32.xlu0 %v179_v23 }
  0x53   : > { %227 = vadd.xlane.f32.xlu1 %v182_v26  ;;  %225 = vadd.xlane.f32.xlu0 %v181_v27 }
  0x57   : > { %231 = vadd.xlane.f32.xlu1 %v184_v30  ;;  %229 = vadd.xlane.f32.xlu0 %v183_v31 }
  0x5b   : > { %235 = vadd.xlane.f32.xlu1 %v186_v34  ;;  %233 = vadd.xlane.f32.xlu0 %v185_v35 }
  0x5f   : > { %239 = vadd.xlane.f32.xlu1 %v188_v38  ;;  %237 = vadd.xlane.f32.xlu0 %v187_v39 }
  0x63   : > { %243 = vadd.xlane.f32.xlu1 %v190_v42  ;;  %241 = vadd.xlane.f32.xlu0 %v189_v43 }
  0x67   : > { %247 = vadd.xlane.f32.xlu1 %v192_v46  ;;  %245 = vadd.xlane.f32.xlu0 %v191_v47 }
  0x6b   : > { %251 = vadd.xlane.f32.xlu1 %v194_v50  ;;  %249 = vadd.xlane.f32.xlu0 %v193_v51 }
  0x6f   : > { %255 = vadd.xlane.f32.xlu1 %v196_v54  ;;  %253 = vadd.xlane.f32.xlu0 %v195_v55 }
  0x73   : > { %259 = vadd.xlane.f32.xlu1 %v198_v58  ;;  %257 = vadd.xlane.f32.xlu0 %v197_v59 }
  0x77   : > { %263 = vadd.xlane.f32.xlu1 %v200_v62  ;;  %261 = vadd.xlane.f32.xlu0 %v199_v63 }
  0xc8   : > { %v206_v3 = vpop.xlane.xlu1 %205  ;;  %v202_v4 = vpop.xlane.xlu0 %201 }
  0xc9   : > { %v267_v6 = vmax.f32 %v206_v3, 1e-24  ;;  %v265_v7 = vmax.f32 %v202_v4, 1e-24 }
  0xcb   : > { %546 = vrsqrt.f32 %v267_v6 }
  0xcc   : > { %548 = vrsqrt.f32 %v265_v7  ;;  %v208_v10 = vpop.xlane.xlu1 %207  ;;  %v204_v11 = vpop.xlane.xlu0 %203 }
  0xcd   : > { %v268_v14 = vmax.f32 %v208_v10, 1e-24  ;;  %v266_v15 = vmax.f32 %v204_v11, 1e-24 }
  0xcf   : > { %550 = vrsqrt.f32 %v268_v14 }
  0xd0   : > { %552 = vrsqrt.f32 %v266_v15  ;;  %v212_v18 = vpop.xlane.xlu1 %211  ;;  %v210_v19 = vpop.xlane.xlu0 %209 }
  0xd1   : > { %v270_v22 = vmax.f32 %v212_v18, 1e-24  ;;  %v269_v23 = vmax.f32 %v210_v19, 1e-24 }
  0xd3   : > { %554 = vrsqrt.f32 %v270_v22 }
  0xd4   : > { %556 = vrsqrt.f32 %v269_v23  ;;  %v216_v26 = vpop.xlane.xlu1 %215  ;;  %v214_v27 = vpop.xlane.xlu0 %213 }
  0xd5   : > { %v547_v30 = vpop.eup %546  ;;  %v272_v31 = vmax.f32 %v216_v26, 1e-24  ;;  %v271_v34 = vmax.f32 %v214_v27, 1e-24 }
  0xd6   : > { %v549_v35 = vpop.eup %548  ;;  %v331_v38 = vmul.f32 %v547_v30, %v840_v0 }
  0xd7   : > { %v329_v39 = vmul.f32 %v549_v35, %v843_v1  ;;  %558 = vrsqrt.f32 %v272_v31 }
  0xd8   : > { %363 = vst [vmem:[%s1003_s17 + $0x10] sm:$0xff] %v331_v38  ;;  %560 = vrsqrt.f32 %v271_v34  ;;  %v220_v42 = vpop.xlane.xlu1 %219  ;;  %v218_v43 = vpop.xlane.xlu0 %217 }
  0xd9   : > { %v551_v46 = vpop.eup %550  ;;  %361 = vst [vmem:[%s1003_s17] sm:$0xff] %v329_v39  ;;  %v274_v47 = vmax.f32 %v220_v42, 1e-24  ;;  %v273_v50 = vmax.f32 %v218_v43, 1e-24 }
  0xda   : > { %v553_v51 = vpop.eup %552  ;;  %v332_v0 = vmul.f32 %v551_v46, %v846_v2 }
  0xdb   : > { %v330_v1 = vmul.f32 %v553_v51, %v853_v5  ;;  %562 = vrsqrt.f32 %v274_v47 }
  0xdc   : > { %364 = vst [vmem:[%s1003_s17 + $0x18] sm:$0xff] %v332_v0  ;;  %564 = vrsqrt.f32 %v273_v50  ;;  %v224_v54 = vpop.xlane.xlu1 %223  ;;  %v222_v55 = vpop.xlane.xlu0 %221 }
  0xdd   : > { %v555_v58 = vpop.eup %554  ;;  %362 = vst [vmem:[%s1003_s17 + $0x8] sm:$0xff] %v330_v1  ;;  %v276_v59 = vmax.f32 %v224_v54, 1e-24  ;;  %v275_v62 = vmax.f32 %v222_v55, 1e-24 }
  0xde   : > { %v557_v63 = vpop.eup %556  ;;  %v334_v3 = vmul.f32 %v555_v58, %v860_v8 }
  0xdf   : > { %v333_v4 = vmul.f32 %v557_v63, %v863_v9  ;;  %566 = vrsqrt.f32 %v276_v59 }
  0xe0   : > { %366 = vst [vmem:[%s1003_s17 + $0x28] sm:$0xff] %v334_v3  ;;  %568 = vrsqrt.f32 %v275_v62  ;;  %v228_v2 = vpop.xlane.xlu1 %227  ;;  %v226_v5 = vpop.xlane.xlu0 %225 }
  0xe1   : > { %v559_v6 = vpop.eup %558  ;;  %365 = vst [vmem:[%s1003_s17 + $0x20] sm:$0xff] %v333_v4  ;;  %v278_v7 = vmax.f32 %v228_v2, 1e-24  ;;  %v277_v10 = vmax.f32 %v226_v5, 1e-24 }
  0xe2   : > { %v561_v11 = vpop.eup %560  ;;  %v336_v14 = vmul.f32 %v559_v6, %v870_v12 }
  0xe3   : > { %v335_v15 = vmul.f32 %v561_v11, %v873_v13  ;;  %570 = vrsqrt.f32 %v278_v7 }
  0xe4   : > { %368 = vst [vmem:[%s1003_s17 + $0x38] sm:$0xff] %v336_v14  ;;  %572 = vrsqrt.f32 %v277_v10  ;;  %v232_v8 = vpop.xlane.xlu1 %231  ;;  %v230_v9 = vpop.xlane.xlu0 %229 }
  0xe5   : > { %v563_v18 = vpop.eup %562  ;;  %367 = vst [vmem:[%s1003_s17 + $0x30] sm:$0xff] %v335_v15  ;;  %v280_v19 = vmax.f32 %v232_v8, 1e-24  ;;  %v279_v22 = vmax.f32 %v230_v9, 1e-24 }
  0xe6   : > { %v565_v23 = vpop.eup %564  ;;  %v338_v26 = vmul.f32 %v563_v18, %v880_v16 }
  0xe7   : > { %v337_v27 = vmul.f32 %v565_v23, %v883_v17  ;;  %574 = vrsqrt.f32 %v280_v19 }
  0xe8   : > { %370 = vst [vmem:[%s1003_s17 + $0x48] sm:$0xff] %v338_v26  ;;  %576 = vrsqrt.f32 %v279_v22  ;;  %v236_v12 = vpop.xlane.xlu1 %235  ;;  %v234_v13 = vpop.xlane.xlu0 %233 }
  0xe9   : > { %v567_v30 = vpop.eup %566  ;;  %369 = vst [vmem:[%s1003_s17 + $0x40] sm:$0xff] %v337_v27  ;;  %v282_v31 = vmax.f32 %v236_v12, 1e-24  ;;  %v281_v34 = vmax.f32 %v234_v13, 1e-24 }
  0xea   : > { %v569_v35 = vpop.eup %568  ;;  %v340_v38 = vmul.f32 %v567_v30, %v890_v20 }
  0xeb   : > { %v339_v39 = vmul.f32 %v569_v35, %v893_v21  ;;  %578 = vrsqrt.f32 %v282_v31 }
  0xec   : > { %372 = vst [vmem:[%s1003_s17 + $0x58] sm:$0xff] %v340_v38  ;;  %580 = vrsqrt.f32 %v281_v34  ;;  %v240_v16 = vpop.xlane.xlu1 %239  ;;  %v238_v17 = vpop.xlane.xlu0 %237 }
  0xed   : > { %v571_v42 = vpop.eup %570  ;;  %371 = vst [vmem:[%s1003_s17 + $0x50] sm:$0xff] %v339_v39  ;;  %v284_v43 = vmax.f32 %v240_v16, 1e-24  ;;  %v283_v46 = vmax.f32 %v238_v17, 1e-24 }
  0xee   : > { %v573_v47 = vpop.eup %572  ;;  %v342_v50 = vmul.f32 %v571_v42, %v900_v24 }
  0xef   : > { %v341_v51 = vmul.f32 %v573_v47, %v903_v25  ;;  %582 = vrsqrt.f32 %v284_v43 }
  0xf0   : > { %374 = vst [vmem:[%s1003_s17 + $0x68] sm:$0xff] %v342_v50  ;;  %584 = vrsqrt.f32 %v283_v46  ;;  %v244_v20 = vpop.xlane.xlu1 %243  ;;  %v242_v21 = vpop.xlane.xlu0 %241 }
  0xf1   : > { %v575_v0 = vpop.eup %574  ;;  %373 = vst [vmem:[%s1003_s17 + $0x60] sm:$0xff] %v341_v51  ;;  %v286_v1 = vmax.f32 %v244_v20, 1e-24  ;;  %v285_v54 = vmax.f32 %v242_v21, 1e-24 }
  0xf2   : > { %v577_v55 = vpop.eup %576  ;;  %v344_v58 = vmul.f32 %v575_v0, %v910_v28 }
  0xf3   : > { %v343_v59 = vmul.f32 %v577_v55, %v913_v29  ;;  %586 = vrsqrt.f32 %v286_v1 }
  0xf4   : > { %376 = vst [vmem:[%s1003_s17 + $0x78] sm:$0xff] %v344_v58  ;;  %588 = vrsqrt.f32 %v285_v54  ;;  %v248_v24 = vpop.xlane.xlu1 %247  ;;  %v246_v25 = vpop.xlane.xlu0 %245 }
  0xf5   : > { %v579_v62 = vpop.eup %578  ;;  %375 = vst [vmem:[%s1003_s17 + $0x70] sm:$0xff] %v343_v59  ;;  %v288_v63 = vmax.f32 %v248_v24, 1e-24  ;;  %v287_v3 = vmax.f32 %v246_v25, 1e-24 }
  0xf6   : > { %v581_v4 = vpop.eup %580  ;;  %v346_v2 = vmul.f32 %v579_v62, %v920_v32 }
  0xf7   : > { %v345_v5 = vmul.f32 %v581_v4, %v923_v33  ;;  %590 = vrsqrt.f32 %v288_v63 }
  0xf8   : > { %378 = vst [vmem:[%s1003_s17 + $0x88] sm:$0xff] %v346_v2  ;;  %592 = vrsqrt.f32 %v287_v3  ;;  %v252_v28 = vpop.xlane.xlu1 %251  ;;  %v250_v29 = vpop.xlane.xlu0 %249 }
  0xf9   : > { %v583_v6 = vpop.eup %582  ;;  %377 = vst [vmem:[%s1003_s17 + $0x80] sm:$0xff] %v345_v5  ;;  %v290_v7 = vmax.f32 %v252_v28, 1e-24  ;;  %v289_v10 = vmax.f32 %v250_v29, 1e-24 }
  0xfa   : > { %v585_v11 = vpop.eup %584  ;;  %v348_v14 = vmul.f32 %v583_v6, %v930_v36 }
  0xfb   : > { %v347_v15 = vmul.f32 %v585_v11, %v933_v37  ;;  %594 = vrsqrt.f32 %v290_v7 }
  0xfc   : > { %380 = vst [vmem:[%s1003_s17 + $0x98] sm:$0xff] %v348_v14  ;;  %596 = vrsqrt.f32 %v289_v10  ;;  %v256_v32 = vpop.xlane.xlu1 %255  ;;  %v254_v33 = vpop.xlane.xlu0 %253 }
  0xfd   : > { %v587_v8 = vpop.eup %586  ;;  %379 = vst [vmem:[%s1003_s17 + $0x90] sm:$0xff] %v347_v15  ;;  %v292_v9 = vmax.f32 %v256_v32, 1e-24  ;;  %v291_v18 = vmax.f32 %v254_v33, 1e-24 }
  0xfe   : > { %v589_v19 = vpop.eup %588  ;;  %v350_v22 = vmul.f32 %v587_v8, %v940_v40 }
  0xff   : > { %v349_v23 = vmul.f32 %v589_v19, %v943_v41  ;;  %598 = vrsqrt.f32 %v292_v9 }
 0x100   : > { %382 = vst [vmem:[%s1003_s17 + $0xa8] sm:$0xff] %v350_v22  ;;  %600 = vrsqrt.f32 %v291_v18  ;;  %v260_v36 = vpop.xlane.xlu1 %259  ;;  %v258_v37 = vpop.xlane.xlu0 %257 }
 0x101   : > { %v591_v26 = vpop.eup %590  ;;  %381 = vst [vmem:[%s1003_s17 + $0xa0] sm:$0xff] %v349_v23  ;;  %v294_v27 = vmax.f32 %v260_v36, 1e-24  ;;  %v293_v12 = vmax.f32 %v258_v37, 1e-24 }
 0x102   : > { %v593_v13 = vpop.eup %592  ;;  %v352_v30 = vmul.f32 %v591_v26, %v950_v44 }
 0x103   : > { %v351_v31 = vmul.f32 %v593_v13, %v953_v45  ;;  %602 = vrsqrt.f32 %v294_v27 }
 0x104   : > { %384 = vst [vmem:[%s1003_s17 + $0xb8] sm:$0xff] %v352_v30  ;;  %604 = vrsqrt.f32 %v293_v12  ;;  %v264_v40 = vpop.xlane.xlu1 %263  ;;  %v262_v41 = vpop.xlane.xlu0 %261 }
 0x105   : > { %v595_v34 = vpop.eup %594  ;;  %383 = vst [vmem:[%s1003_s17 + $0xb0] sm:$0xff] %v351_v31  ;;  %v296_v35 = vmax.f32 %v264_v40, 1e-24  ;;  %v295_v38 = vmax.f32 %v262_v41, 1e-24 }
 0x106   : > { %v597_v39 = vpop.eup %596  ;;  %v354_v16 = vmul.f32 %v595_v34, %v960_v48 }
 0x107   : > { %v353_v44 = vmul.f32 %v597_v39, %v963_v49  ;;  %606 = vrsqrt.f32 %v296_v35 }
 0x108   : > { %386 = vst [vmem:[%s1003_s17 + $0xc8] sm:$0xff] %v354_v16  ;;  %608 = vrsqrt.f32 %v295_v38 }
 0x109   : > { %v599_v45 = vpop.eup %598  ;;  %385 = vst [vmem:[%s1003_s17 + $0xc0] sm:$0xff] %v353_v44 }
 0x10a   : > { %v601_v17 = vpop.eup %600  ;;  %v356_v42 = vmul.f32 %v599_v45, %v970_v52 }
 0x10b   : > { %v355_v43 = vmul.f32 %v601_v17, %v973_v53 }
 0x10c   : > { %388 = vst [vmem:[%s1003_s17 + $0xd8] sm:$0xff] %v356_v42 }
 0x10d   : > { %v603_v46 = vpop.eup %602  ;;  %387 = vst [vmem:[%s1003_s17 + $0xd0] sm:$0xff] %v355_v43 }
 0x10e   : > { %v605_v48 = vpop.eup %604  ;;  %v358_v49 = vmul.f32 %v603_v46, %v980_v56 }
 0x10f   : > { %v357_v47 = vmul.f32 %v605_v48, %v983_v57 }
 0x110   : > { %390 = vst [vmem:[%s1003_s17 + $0xe8] sm:$0xff] %v358_v49 }
 0x111   : > { %v607_v50 = vpop.eup %606  ;;  %389 = vst [vmem:[%s1003_s17 + $0xe0] sm:$0xff] %v357_v47 }
 0x112   : > { %v609_v52 = vpop.eup %608  ;;  %v360_v53 = vmul.f32 %v607_v50, %v990_v60 }
 0x113   : > { %v359_v56 = vmul.f32 %v609_v52, %v993_v61 }
 0x114   : > { %392 = vst [vmem:[%s1003_s17 + $0xf8] sm:$0xff] %v360_v53 }
 0x115   : > { %391 = vst [vmem:[%s1003_s17 + $0xf0] sm:$0xff] %v359_v56 }
 0x116   : > { %653 = shalt.err (!%p650_p1)
}
 0x117   : > { %s654_s13 = scalar_lea.hbm %s1069_s2, 4096  ;;  %s658_s20 = scalar_lea.hbm %s1118_s1, 16384 }
 0x118   : > { %p655_p3 = scmp.ne.s32.totalorder %s1069_s2, %s654_s13  ;;  %p659_p0 = scmp.lt.u32.totalorder %s1069_s2, %s1118_s1 }
 0x119   : > { %p660_p2 = scmp.lt.u32.totalorder %s658_s20, %s654_s13  ;;  %p662_p6 = scmp.lt.u32.totalorder %s654_s13, %s1069_s2 }
 0x11a   : > { %p656_p4 = pnand %p655_p3, %p1125_p10 }
 0x11b   : > { %p661_p7 = por %p660_p2, %p659_p0 }
 0x11c   : > { %p657_p5 = pneg %p656_p4 }
 0x11d   : > { %p663_p11 = por %p662_p6, %p661_p7 }
 0x11f   : > { %p664_p12 = pnand %p663_p11, %p657_p5 }
 0x121   : > { %667 = shalt.err (!%p664_p12)
}
 0x122   : > { %s712_s24 = smov 128   ;;  %s713_s26 = smov 8  }
 0x123   : > { %498 = dma.vmem_to_hbm [thread:$0]  (%p1125_p10), %s1071_s27, 4096, %s1069_s2, %s394_s10, %s712_s24, %s712_s24, %s713_s26  }
 0x124 PF: > { %p509_p8 = scmp.ge.s32.totalorder %s706_s9, 2  ;;  %s422_s30 = sand.u32 1, %s694_s6  }
 0x125   : > { %p1126_p9 = scmp.ne.s32.totalorder %s1123_s19, 0  ;;  %s423_s17 = scalar_lea.sflag [#allocation4], %s422_s30 }
 0x127   : > { %p505_p13 = pnand %p509_p8, %p1126_p9 }
 0x129   : > { %689 = dma.done.wait (!%p505_p13), %s423_s17, 4096  }
 0x12a   : > { %691 = vsyncadd (!%p505_p13), %s423_s17, 4294963200  ;;  %p14_p1 = scmp.ge.s32.totalorder %s749_s12, 6   ;;  %s1127_s6 = smov %s698_s7 }
 0x12b   : > { %s1128_s7 = smov %s702_s8  ;;  %s1129_s8 = smov %s761_s15 }
 0x12c   : > { %s1130_s9 = smov %s749_s12  ;;  %16 = sbr.rel (!%p14_p1) target bundleno = 5 (0x5), region = 69 }
 0x133   :  { %428 = vsyncpa [#allocation3], 1 }
 0x134   :  { %430 = vsyncpa [#allocation3 + $0x1], 1 }
 0x135   :  { %431 = vsyncpa [#allocation4], 1 }
 0x136   :  { %433 = vsyncpa [#allocation4 + $0x1], 1 }

</bundles_post_ra>
